<compile_context>
chip_gen: v7x
topology: tpu7x:2x2x1
jax: 0.10.0
libtpu: 0.0.40
codegen_flags: <defaults>
</compile_context>

<pallas_src>
import jax
import jax.numpy as jnp
from jax.experimental import pallas as pl
from jax.experimental.pallas import tpu as pltpu


def _round_up(x, m):
    return (x + m - 1) // m * m


def pointgencon_kernel(x_ref, w1_ref, b1_ref, w2_ref, b2_ref, w3_ref, b3_ref,
                       w4_ref, b4_ref, out_ref):
    # x_ref block: (TN, C0) rows = flattened (batch, point) pairs.
    x = x_ref[...].astype(jnp.bfloat16)                                # (TN, C0)

    # conv1 + folded bn1 + relu   (C0 -> C0)
    h = jnp.dot(x, w1_ref[...], preferred_element_type=jnp.float32)
    h = jnp.maximum(h + b1_ref[...], 0.0).astype(jnp.bfloat16)         # (TN, C0)

    # conv2 + folded bn2 + relu   (C0 -> C0//2)
    h = jnp.dot(h, w2_ref[...], preferred_element_type=jnp.float32)
    h = jnp.maximum(h + b2_ref[...], 0.0).astype(jnp.bfloat16)         # (TN, C0//2)

    # conv3 + folded bn3 + relu   (C0//2 -> C0//4)
    h = jnp.dot(h, w3_ref[...], preferred_element_type=jnp.float32)
    h = jnp.maximum(h + b3_ref[...], 0.0).astype(jnp.bfloat16)         # (TN, C0//4)

    # conv4 + tanh                (C0//4 -> odim), no BatchNorm
    h = jnp.dot(h, w4_ref[...], preferred_element_type=jnp.float32) + b4_ref[...]
    out_ref[...] = jnp.tanh(h)                                         # (TN, odim)


def pointgencon_forward(x_bcn, w1, b1, w2, b2, w3, b3, w4, b4):
    """x_bcn: (B, C_in, N) float32 in PyTorch NCW layout. Returns (B, odim, N)."""
    B, C0, N = x_bcn.shape
    odim = w4.shape[1]

    # Channels-last and flatten (batch, point) -> rows; k=1 conv == row matmul.
    x_flat = jnp.transpose(x_bcn, (0, 2, 1)).reshape(B * N, C0)
    M = B * N

    # Tile the row (points) axis: bounds VMEM for any point count.
    TN = min(512, _round_up(M, 8))
    M_pad = _round_up(M, TN)
    if M_pad != M:
        x_flat = jnp.pad(x_flat, ((0, M_pad - M), (0, 0)))  # zero rows, dropped below

    full = lambda i: (0, 0)  # weights / biases resident (constant block index)

    out_flat = pl.pallas_call(
        pointgencon_kernel,
        out_shape=jax.ShapeDtypeStruct((M_pad, odim), jnp.float32),
        grid_spec=pltpu.PrefetchScalarGridSpec(
            num_scalar_prefetch=0,
            grid=(M_pad // TN,),
            in_specs=[
                pl.BlockSpec((TN, C0), lambda i: (i, 0)),   # x row tile
                pl.BlockSpec(w1.shape, full),               # W1 (bf16, bn-folded)
                pl.BlockSpec(b1.shape, full),               # b1 (f32, bn-folded)
                pl.BlockSpec(w2.shape, full),               # W2
                pl.BlockSpec(b2.shape, full),               # b2
                pl.BlockSpec(w3.shape, full),               # W3
                pl.BlockSpec(b3.shape, full),               # b3
                pl.BlockSpec(w4.shape, full),               # W4 (no bn)
                pl.BlockSpec(b4.shape, full),               # b4
            ],
            out_specs=pl.BlockSpec((TN, odim), lambda i: (i, 0)),
        ),
        compiler_params=pltpu.CompilerParams(
            dimension_semantics=("parallel",),
            vmem_limit_bytes=32 * 1024 * 1024,
        ),
    )(x_flat, w1, b1, w2, b2, w3, b3, w4, b4)

    out = out_flat[:M].reshape(B, N, odim)
    return jnp.transpose(out, (0, 2, 1))  # (B, odim, N), PyTorch layout


def fold_bn(w, b, gamma, beta, running_mean, running_var, eps=1e-5):
    """Fold inference-mode BatchNorm1d into a k=1 conv.
    w: (C_in, C_out); b/gamma/beta/mean/var: (C_out,)."""
    scale = gamma / jnp.sqrt(running_var + eps)
    w_eff = w * scale[None, :]
    b_eff = (b - running_mean) * scale + beta
    return w_eff, b_eff


def make_params(key, bottleneck=256, odim=3):
    """Deterministic synthetic parameters matching PointGenCon.__init__ shapes.
    Returns bn-folded weights (bf16) and biases (f32, shape (1, C))."""
    cs = [bottleneck, bottleneck, bottleneck // 2, bottleneck // 4, odim]
    keys = iter(jax.random.split(key, 32))

    def conv(c_in, c_out):
        # PyTorch Conv1d weight is (c_out, c_in, 1); stored transposed (c_in, c_out).
        bound = 1.0 / (c_in ** 0.5)
        w = jax.random.uniform(next(keys), (c_in, c_out), jnp.float32, -bound, bound)
        b = jax.random.uniform(next(keys), (c_out,), jnp.float32, -bound, bound)
        return w, b

    def bn(c):
        gamma = 1.0 + 0.1 * jax.random.normal(next(keys), (c,), jnp.float32)
        beta = 0.1 * jax.random.normal(next(keys), (c,), jnp.float32)
        mean = 0.1 * jax.random.normal(next(keys), (c,), jnp.float32)
        var = 1.0 + 0.1 * jax.random.uniform(next(keys), (c,), jnp.float32)
        return gamma, beta, mean, var

    params = []
    for li in range(3):                       # conv1..conv3 each followed by BN
        w, b = conv(cs[li], cs[li + 1])
        w, b = fold_bn(w, b, *bn(cs[li + 1]))
        params += [w.astype(jnp.bfloat16), b.astype(jnp.float32)[None, :]]
    w4, b4 = conv(cs[3], cs[4])               # conv4: no BN, tanh
    params += [w4.astype(jnp.bfloat16), b4.astype(jnp.float32)[None, :]]
    return tuple(params)


def reference_forward(x_bcn, w1, b1, w2, b2, w3, b3, w4, b4):
    """Plain-JAX reference with identical bf16-matmul / f32-accumulate math."""
    B, C0, N = x_bcn.shape
    h = jnp.transpose(x_bcn, (0, 2, 1)).reshape(B * N, C0)
    for w, b in ((w1, b1), (w2, b2), (w3, b3)):
        h = jnp.maximum(
            jnp.dot(h.astype(jnp.bfloat16), w, preferred_element_type=jnp.float32) + b,
            0.0)
    h = jnp.tanh(
        jnp.dot(h.astype(jnp.bfloat16), w4, preferred_element_type=jnp.float32) + b4)
    return jnp.transpose(h.reshape(B, N, -1), (0, 2, 1))


if __name__ == "__main__":
    key = jax.random.PRNGKey(0)
    k_x, k_p = jax.random.split(key)

    # Small demo shapes: 2 clouds, 64 points, bottleneck 256 (->128->64->3).
    B, N = 2, 64
    BOTTLENECK, ODIM = 256, 3

    x = jax.random.normal(k_x, (B, BOTTLENECK, N), jnp.float32)  # PyTorch NCW layout
    params = make_params(k_p, BOTTLENECK, ODIM)

    out = pointgencon_forward(x, *params)
    out = jax.block_until_ready(out)

    ref = reference_forward(x, *params)
    assert out.shape == (B, ODIM, N), out.shape
    assert jnp.all(jnp.abs(out) <= 1.0 + 1e-6), "tanh range violated"
    assert jnp.allclose(out, ref, atol=2e-2, rtol=2e-2), "mismatch vs reference"

    print("KERNEL_OK")
</pallas_src>

<mosaic_0001>
module attributes {stable_mosaic.version = 11 : i64} {
  func.func @pointgencon_kernel(%arg0: i32, %arg1: memref<128x256xf32, #tpu.memory_space<vmem>>, %arg2: memref<256x256xbf16, #tpu.memory_space<vmem>>, %arg3: memref<1x256xf32, #tpu.memory_space<vmem>>, %arg4: memref<256x128xbf16, #tpu.memory_space<vmem>>, %arg5: memref<1x128xf32, #tpu.memory_space<vmem>>, %arg6: memref<128x64xbf16, #tpu.memory_space<vmem>>, %arg7: memref<1x64xf32, #tpu.memory_space<vmem>>, %arg8: memref<64x3xbf16, #tpu.memory_space<vmem>>, %arg9: memref<1x3xf32, #tpu.memory_space<vmem>>, %arg10: memref<128x3xf32, #tpu.memory_space<vmem>>) attributes {dimension_semantics = [#tpu.dimension_semantics<parallel>], iteration_bounds = array<i64: 1>, scalar_prefetch = 0 : i64, scratch_operands = 0 : i64, tpu.core_type = #tpu.core_type<tc>, window_params = [{transform_indices = @transform_0, window_bounds = array<i64: 128, 256>}, {pipeline_mode = #tpu.pipeline_mode<synchronous>, transform_indices = @transform_1, window_bounds = array<i64: 256, 256>}, {pipeline_mode = #tpu.pipeline_mode<synchronous>, transform_indices = @transform_2, window_bounds = array<i64: 1, 256>}, {pipeline_mode = #tpu.pipeline_mode<synchronous>, transform_indices = @transform_3, window_bounds = array<i64: 256, 128>}, {pipeline_mode = #tpu.pipeline_mode<synchronous>, transform_indices = @transform_4, window_bounds = array<i64: 1, 128>}, {pipeline_mode = #tpu.pipeline_mode<synchronous>, transform_indices = @transform_5, window_bounds = array<i64: 128, 64>}, {pipeline_mode = #tpu.pipeline_mode<synchronous>, transform_indices = @transform_6, window_bounds = array<i64: 1, 64>}, {pipeline_mode = #tpu.pipeline_mode<synchronous>, transform_indices = @transform_7, window_bounds = array<i64: 64, 3>}, {pipeline_mode = #tpu.pipeline_mode<synchronous>, transform_indices = @transform_8, window_bounds = array<i64: 1, 3>}, {transform_indices = @transform_9, window_bounds = array<i64: 128, 3>}]} {
    %c0 = arith.constant 0 : index
    %c0_0 = arith.constant 0 : index
    %0 = vector.load %arg1[%c0, %c0_0] : memref<128x256xf32, #tpu.memory_space<vmem>>, vector<128x256xf32>
    %1 = arith.truncf %0 : vector<128x256xf32> to vector<128x256xbf16>
    %c0_1 = arith.constant 0 : index
    %c0_2 = arith.constant 0 : index
    %2 = vector.load %arg2[%c0_1, %c0_2] : memref<256x256xbf16, #tpu.memory_space<vmem>>, vector<256x256xbf16>
    %cst = arith.constant dense<0.000000e+00> : vector<128x256xf32>
    %3 = tpu.matmul %1, %2, %cst {dimension_numbers = #tpu.dot_dimension_numbers<[1], [0], [0], [1], [0, 0, 1, 1], [], []>} : vector<128x256xbf16>, vector<256x256xbf16>, vector<128x256xf32> -> vector<128x256xf32>
    %c0_3 = arith.constant 0 : index
    %c0_4 = arith.constant 0 : index
    %4 = vector.load %arg3[%c0_3, %c0_4] : memref<1x256xf32, #tpu.memory_space<vmem>>, vector<1x256xf32>
    %5 = vector.broadcast %4 : vector<1x256xf32> to vector<128x256xf32>
    %6 = arith.addf %3, %5 : vector<128x256xf32>
    %cst_5 = arith.constant 0.000000e+00 : f32
    %7 = vector.broadcast %cst_5 : f32 to vector<128x256xf32>
    %8 = arith.maximumf %6, %7 : vector<128x256xf32>
    %9 = arith.truncf %8 : vector<128x256xf32> to vector<128x256xbf16>
    %c0_6 = arith.constant 0 : index
    %c0_7 = arith.constant 0 : index
    %10 = vector.load %arg4[%c0_6, %c0_7] : memref<256x128xbf16, #tpu.memory_space<vmem>>, vector<256x128xbf16>
    %cst_8 = arith.constant dense<0.000000e+00> : vector<128x128xf32>
    %11 = tpu.matmul %9, %10, %cst_8 {dimension_numbers = #tpu.dot_dimension_numbers<[1], [0], [0], [1], [0, 0, 1, 1], [], []>} : vector<128x256xbf16>, vector<256x128xbf16>, vector<128x128xf32> -> vector<128x128xf32>
    %c0_9 = arith.constant 0 : index
    %c0_10 = arith.constant 0 : index
    %12 = vector.load %arg5[%c0_9, %c0_10] : memref<1x128xf32, #tpu.memory_space<vmem>>, vector<1x128xf32>
    %13 = vector.broadcast %12 : vector<1x128xf32> to vector<128x128xf32>
    %14 = arith.addf %11, %13 : vector<128x128xf32>
    %cst_11 = arith.constant 0.000000e+00 : f32
    %15 = vector.broadcast %cst_11 : f32 to vector<128x128xf32>
    %16 = arith.maximumf %14, %15 : vector<128x128xf32>
    %17 = arith.truncf %16 : vector<128x128xf32> to vector<128x128xbf16>
    %c0_12 = arith.constant 0 : index
    %c0_13 = arith.constant 0 : index
    %18 = vector.load %arg6[%c0_12, %c0_13] : memref<128x64xbf16, #tpu.memory_space<vmem>>, vector<128x64xbf16>
    %cst_14 = arith.constant dense<0.000000e+00> : vector<128x64xf32>
    %19 = tpu.matmul %17, %18, %cst_14 {dimension_numbers = #tpu.dot_dimension_numbers<[1], [0], [0], [1], [0, 0, 1, 1], [], []>} : vector<128x128xbf16>, vector<128x64xbf16>, vector<128x64xf32> -> vector<128x64xf32>
    %c0_15 = arith.constant 0 : index
    %c0_16 = arith.constant 0 : index
    %20 = vector.load %arg7[%c0_15, %c0_16] : memref<1x64xf32, #tpu.memory_space<vmem>>, vector<1x64xf32>
    %21 = vector.broadcast %20 : vector<1x64xf32> to vector<128x64xf32>
    %22 = arith.addf %19, %21 : vector<128x64xf32>
    %cst_17 = arith.constant 0.000000e+00 : f32
    %23 = vector.broadcast %cst_17 : f32 to vector<128x64xf32>
    %24 = arith.maximumf %22, %23 : vector<128x64xf32>
    %25 = arith.truncf %24 : vector<128x64xf32> to vector<128x64xbf16>
    %c0_18 = arith.constant 0 : index
    %c0_19 = arith.constant 0 : index
    %26 = vector.load %arg8[%c0_18, %c0_19] : memref<64x3xbf16, #tpu.memory_space<vmem>>, vector<64x3xbf16>
    %cst_20 = arith.constant dense<0.000000e+00> : vector<128x3xf32>
    %27 = tpu.matmul %25, %26, %cst_20 {dimension_numbers = #tpu.dot_dimension_numbers<[1], [0], [0], [1], [0, 0, 1, 1], [], []>} : vector<128x64xbf16>, vector<64x3xbf16>, vector<128x3xf32> -> vector<128x3xf32>
    %c0_21 = arith.constant 0 : index
    %c0_22 = arith.constant 0 : index
    %28 = vector.load %arg9[%c0_21, %c0_22] : memref<1x3xf32, #tpu.memory_space<vmem>>, vector<1x3xf32>
    %29 = vector.broadcast %28 : vector<1x3xf32> to vector<128x3xf32>
    %30 = arith.addf %27, %29 : vector<128x3xf32>
    %31 = math.tanh %30 : vector<128x3xf32>
    %c0_23 = arith.constant 0 : index
    %c0_24 = arith.constant 0 : index
    %32 = vector.load %arg10[%c0_23, %c0_24] : memref<128x3xf32, #tpu.memory_space<vmem>>, vector<128x3xf32>
    tpu.vector_store %arg10[%c0_23, %c0_24], %31 {strides = array<i32>} : memref<128x3xf32, #tpu.memory_space<vmem>>, vector<128x3xf32>,
    return
  }
  func.func @transform_0(%arg0: i32) -> (i32, i32) {
    %c0_i32 = arith.constant 0 : i32
    %c0_i32_0 = arith.constant 0 : i32
    return %arg0, %c0_i32 : i32, i32
  }
  func.func @transform_1(%arg0: i32) -> (i32, i32) {
    %c0_i32 = arith.constant 0 : i32
    %c0_i32_0 = arith.constant 0 : i32
    %c0_i32_1 = arith.constant 0 : i32
    return %c0_i32, %c0_i32_0 : i32, i32
  }
  func.func @transform_2(%arg0: i32) -> (i32, i32) {
    %c0_i32 = arith.constant 0 : i32
    %c0_i32_0 = arith.constant 0 : i32
    %c0_i32_1 = arith.constant 0 : i32
    return %c0_i32, %c0_i32_0 : i32, i32
  }
  func.func @transform_3(%arg0: i32) -> (i32, i32) {
    %c0_i32 = arith.constant 0 : i32
    %c0_i32_0 = arith.constant 0 : i32
    %c0_i32_1 = arith.constant 0 : i32
    return %c0_i32, %c0_i32_0 : i32, i32
  }
  func.func @transform_4(%arg0: i32) -> (i32, i32) {
    %c0_i32 = arith.constant 0 : i32
    %c0_i32_0 = arith.constant 0 : i32
    %c0_i32_1 = arith.constant 0 : i32
    return %c0_i32, %c0_i32_0 : i32, i32
  }
  func.func @transform_5(%arg0: i32) -> (i32, i32) {
    %c0_i32 = arith.constant 0 : i32
    %c0_i32_0 = arith.constant 0 : i32
    %c0_i32_1 = arith.constant 0 : i32
    return %c0_i32, %c0_i32_0 : i32, i32
  }
  func.func @transform_6(%arg0: i32) -> (i32, i32) {
    %c0_i32 = arith.constant 0 : i32
    %c0_i32_0 = arith.constant 0 : i32
    %c0_i32_1 = arith.constant 0 : i32
    return %c0_i32, %c0_i32_0 : i32, i32
  }
  func.func @transform_7(%arg0: i32) -> (i32, i32) {
    %c0_i32 = arith.constant 0 : i32
    %c0_i32_0 = arith.constant 0 : i32
    %c0_i32_1 = arith.constant 0 : i32
    return %c0_i32, %c0_i32_0 : i32, i32
  }
  func.func @transform_8(%arg0: i32) -> (i32, i32) {
    %c0_i32 = arith.constant 0 : i32
    %c0_i32_0 = arith.constant 0 : i32
    %c0_i32_1 = arith.constant 0 : i32
    return %c0_i32, %c0_i32_0 : i32, i32
  }
  func.func @transform_9(%arg0: i32) -> (i32, i32) {
    %c0_i32 = arith.constant 0 : i32
    %c0_i32_0 = arith.constant 0 : i32
    return %arg0, %c0_i32 : i32, i32
  }
}

</mosaic_0001>

<bundles_post_ra>
// kernel: tpu_custom_call.1
= control target key start
LH: loop header
LB: loop body
LE: loop exit
PB: predicated region body
PF: predicated region fallthrough
CT: control target
= control target key end

     0   :  { %14 = vsyncpa [#allocation3], 0  ;;  %s1831_s0 = inlined_call_operand.hbm [shape: f32[128,256], index: 0, kind: input, shape index: {}]   ;;  %s1832_s1 = inlined_call_operand.hbm [shape: bf16[256,256], index: 1, kind: input, shape index: {}]   ;;  %s1833_s2 = inlined_call_operand.vmem [shape: f32[1,256], index: 2, kind: input, shape index: {}]   ;;  %s1834_s3 = inlined_call_operand.vmem [shape: bf16[256,128], index: 3, kind: input, shape index: {}]   ;;  %s1835_s4 = inlined_call_operand.vmem [shape: f32[1,128], index: 4, kind: input, shape index: {}]   ;;  %s1836_s5 = inlined_call_operand.vmem [shape: bf16[128,64], index: 5, kind: input, shape index: {}]   ;;  %s1837_s6 = inlined_call_operand.vmem [shape: f32[1,64], index: 6, kind: input, shape index: {}]   ;;  %s1838_s7 = inlined_call_operand.vmem [shape: bf16[64,3], index: 7, kind: input, shape index: {}]   ;;  %s1839_s8 = inlined_call_operand.vmem [shape: f32[1,3], index: 8, kind: input, shape index: {}]   ;;  %s1840_s9 = inlined_call_operand.vmem [shape: f32[128,3], index: 9, kind: output, shape index: {}]  }
   0x1   :  { %15 = vsyncpa [#allocation5], 0  ;;  %s1511_s30 = smov [#allocation2]   ;;  %s1463_s13 = scalar_lea.hbm %s1831_s0, 4096 }
   0x2   :  { %s21_s10 = sshll.u32 %s1511_s30, 4  ;;  %p1464_p0 = scmp.ne.s32.totalorder %s1831_s0, %s1463_s13  ;;  %s22_s10 = int_to_ptr.vmem [resolvable:$true] %s21_s10 }
   0x3   :  { %p1467_p1 = scmp.lt.u32.totalorder %s1463_s13, %s1831_s0 }
   0x5   :  { %p1469_p2 = pnand %p1467_p1, %p1464_p0 }
   0x7   :  { %1472 = shalt.err (!%p1469_p2)
}
   0x8   :  { %s1473_s18 = scalar_lea.vmem %s22_s10, 4096  ;;  %p1478_p4 = scmp.lt.s32.totalorder %s22_s10, %s22_s10 }
   0x9   :  { %p1474_p3 = scmp.ne.s32.totalorder %s22_s10, %s1473_s18  ;;  %p1479_p5 = scmp.lt.s32.totalorder %s1473_s18, %s1473_s18 }
   0xb   :  { %p1480_p6 = por %p1479_p5, %p1478_p4 }
   0xd   :  { %p1481_p7 = pnand %p1480_p6, %p1474_p3 }
   0xf   :  { %1484 = shalt.err (!%p1481_p7)
}
  0x10   :  { %s1512_s19 = smov 256   ;;  %s1513_s20 = smov 16  }
  0x11   :  { %27 = dma.hbm_to_vmem [thread:$0]  %s1831_s0, 4096, %s22_s10, [#allocation3], %s1512_s19, %s1512_s19, %s1513_s20  }
  0x12   :  { %s1514_s23 = smov [#allocation4]   ;;  %s1485_s27 = scalar_lea.hbm %s1832_s1, 4096 }
  0x13   :  { %s33_s24 = sshll.u32 %s1514_s23, 4  ;;  %p1486_p8 = scmp.ne.s32.totalorder %s1832_s1, %s1485_s27  ;;  %s34_s24 = int_to_ptr.vmem [resolvable:$true] %s33_s24 }
  0x14   :  { %p1489_p9 = scmp.lt.u32.totalorder %s1485_s27, %s1832_s1 }
  0x16   :  { %p1491_p10 = pnand %p1489_p9, %p1486_p8 }
  0x18   :  { %1494 = shalt.err (!%p1491_p10)
}
  0x19   :  { %s1495_s12 = scalar_lea.vmem %s34_s24, 4096  ;;  %p1500_p12 = scmp.lt.s32.totalorder %s34_s24, %s34_s24 }
  0x1a   :  { %p1496_p11 = scmp.ne.s32.totalorder %s34_s24, %s1495_s12  ;;  %p1501_p13 = scmp.lt.s32.totalorder %s1495_s12, %s1495_s12 }
  0x1c   :  { %p1502_p0 = por %p1501_p13, %p1500_p12 }
  0x1e   :  { %p1503_p1 = pnand %p1502_p0, %p1496_p11 }
  0x20   :  { %1506 = shalt.err (!%p1503_p1)
}
  0x21   :  { %s1515_s0 = smov 128   ;;  %s1516_s10 = smov 8  }
  0x22   :  { %39 = dma.hbm_to_vmem [thread:$0]  %s1832_s1, 4096, %s34_s24, [#allocation5], %s1515_s0, %s1515_s0, %s1516_s10  }
  0x23   :  { %1507 = dma.done.wait [#allocation3], 4096  }
  0x24   :  { %1508 = vsyncadd [#allocation3], 4294963200 }
  0x25   :  { %1509 = dma.done.wait [#allocation5], 4096  }
  0x26   :  { %1510 = vsyncadd [#allocation5], 4294963200  ;;  %v1355_v0 = vld [vmem:[#allocation4 + $0x4] ss:$8 sps:$4 sm:$0xff]   ;;  %v1357_v1 = vld [vmem:[#allocation4] ss:$8 sps:$4 sm:$0xff]  }
  0x27   :  { %313 = vmatprep.subr.bf16.mxu0 %v1355_v0  ;;  %v1358_v2 = vld [vmem:[#allocation4 + $0x14] ss:$8 sps:$4 sm:$0xff]   ;;  %v1360_v3 = vld [vmem:[#allocation4 + $0x10] ss:$8 sps:$4 sm:$0xff]   ;;  %v1361_v4 = vld [vmem:[#allocation4 + $0x24] ss:$8 sps:$4 sm:$0xff]  }
  0x28   :  { %314 = vmatpush1.bf16.msra.mxu0 %v1357_v1  ;;  %v1363_v5 = vld [vmem:[#allocation4 + $0x20] ss:$8 sps:$4 sm:$0xff]   ;;  %v1364_v6 = vld [vmem:[#allocation4 + $0x34] ss:$8 sps:$4 sm:$0xff]   ;;  %v1366_v7 = vld [vmem:[#allocation4 + $0x30] ss:$8 sps:$4 sm:$0xff]  }
  0x29   :  { %315 = vmatprep.subr.bf16.mxu0 %v1358_v2  ;;  %v1367_v8 = vld [vmem:[#allocation4 + $0x44] ss:$8 sps:$4 sm:$0xff]   ;;  %v1369_v9 = vld [vmem:[#allocation4 + $0x40] ss:$8 sps:$4 sm:$0xff]   ;;  %v1370_v10 = vld [vmem:[#allocation4 + $0x54] ss:$8 sps:$4 sm:$0xff]  }
  0x2a   :  { %v1372_v11 = vld [vmem:[#allocation4 + $0x50] ss:$8 sps:$4 sm:$0xff]   ;;  %v1373_v12 = vld [vmem:[#allocation4 + $0x64] ss:$8 sps:$4 sm:$0xff]   ;;  %v1375_v16 = vld [vmem:[#allocation4 + $0x60] ss:$8 sps:$4 sm:$0xff]  }
  0x2b   :  { %v62_v13 = vld [vmem:[#allocation2 + $0x8] sm:$0xff]  ;;  %v64_v14 = vld [vmem:[#allocation2 + $0x18] sm:$0xff]  ;;  %v1403_v22 = vld [vmem:[%s1834_s3 + $0x40] sm:$0xff]   ;;  %vm961_vm0 = vcmask 523264   ;;  %vm1099_vm1 = vcmask 23552  }
  0x2c   :  { %316 = vmatpush1.bf16.msra.mxu0 %v1360_v3  ;;  %v94_v15 = vpack.c.bf16 %v64_v14, %v62_v13  ;;  %v1376_v17 = vld [vmem:[#allocation4 + $0x74] ss:$8 sps:$4 sm:$0xff]   ;;  %v1378_v18 = vld [vmem:[#allocation4 + $0x70] ss:$8 sps:$4 sm:$0xff]   ;;  %v1379_v19 = vld [vmem:[#allocation4 + $0x84] ss:$8 sps:$4 sm:$0xff]   ;;  %1193 = vmatprep.subr.bf16.mxu1 %v1403_v22 }
  0x2d   :  { %317 = vmatprep.subr.bf16.mxu0 %v1361_v4  ;;  %v1381_v20 = vld [vmem:[#allocation4 + $0x80] ss:$8 sps:$4 sm:$0xff]   ;;  %v1382_v21 = vld [vmem:[#allocation4 + $0x94] ss:$8 sps:$4 sm:$0xff]   ;;  %v1384_v23 = vld [vmem:[#allocation4 + $0x90] ss:$8 sps:$4 sm:$0xff]  }
  0x2e   :  { %345 = vmatprep.mubr.bf16.mxu0 %v94_v15  ;;  %v1404_v24 = vld [vmem:[%s1834_s3] sm:$0xff]   ;;  %v1405_v26 = vld [vmem:[%s1834_s3 + $0x48] sm:$0xff]   ;;  %v1407_v28 = vld [vmem:[%s1834_s3 + $0x50] sm:$0xff]  }
  0x2f   :  { %v1385_v25 = vld [vmem:[#allocation4 + $0xa4] ss:$8 sps:$4 sm:$0xff]   ;;  %1194 = vmatpush3.bf16.msra.mxu1 %v1404_v24  ;;  %v1387_v29 = vld [vmem:[#allocation4 + $0xa0] ss:$8 sps:$4 sm:$0xff]   ;;  %v1388_v30 = vld [vmem:[#allocation4 + $0xb4] ss:$8 sps:$4 sm:$0xff]  }
  0x30   :  { %318 = vmatpush1.bf16.msra.mxu0 %v1363_v5  ;;  %v1406_v27 = vld [vmem:[%s1834_s3 + $0x8] sm:$0xff]   ;;  %1195 = vmatprep.subr.bf16.mxu1 %v1405_v26  ;;  %v1408_v31 = vld [vmem:[%s1834_s3 + $0x10] sm:$0xff]   ;;  %v1409_v32 = vld [vmem:[%s1834_s3 + $0x58] sm:$0xff]  }
  0x31   :  { %319 = vmatprep.subr.bf16.mxu0 %v1364_v6  ;;  %v1390_v33 = vld [vmem:[#allocation4 + $0xb0] ss:$8 sps:$4 sm:$0xff]   ;;  %v1391_v34 = vld [vmem:[#allocation4 + $0xc4] ss:$8 sps:$4 sm:$0xff]   ;;  %v1393_v37 = vld [vmem:[#allocation4 + $0xc0] ss:$8 sps:$4 sm:$0xff]  }
  0x32   :  { %v1410_v35 = vld [vmem:[%s1834_s3 + $0x18] sm:$0xff]   ;;  %v1411_v36 = vld [vmem:[%s1834_s3 + $0x60] sm:$0xff]   ;;  %v1413_v40 = vld [vmem:[%s1834_s3 + $0x68] sm:$0xff]  }
  0x33   :  { %1196 = vmatpush3.bf16.msra.mxu1 %v1406_v27  ;;  %v1412_v38 = vld [vmem:[%s1834_s3 + $0x20] sm:$0xff]   ;;  %v1394_v39 = vld [vmem:[#allocation4 + $0xd4] ss:$8 sps:$4 sm:$0xff]   ;;  %v1396_v41 = vld [vmem:[#allocation4 + $0xd0] ss:$8 sps:$4 sm:$0xff]  }
  0x34   :  { %320 = vmatpush1.bf16.msra.mxu0 %v1366_v7  ;;  %1197 = vmatprep.subr.bf16.mxu1 %v1407_v28  ;;  %v1397_v42 = vld [vmem:[#allocation4 + $0xe4] ss:$8 sps:$4 sm:$0xff]   ;;  %v1399_v43 = vld [vmem:[#allocation4 + $0xe0] ss:$8 sps:$4 sm:$0xff]   ;;  %v1400_v44 = vld [vmem:[#allocation4 + $0xf4] ss:$8 sps:$4 sm:$0xff]  }
  0x35   :  { %321 = vmatprep.subr.bf16.mxu0 %v1367_v8  ;;  %v1402_v45 = vld [vmem:[#allocation4 + $0xf0] ss:$8 sps:$4 sm:$0xff]   ;;  %v61_v46 = vld [vmem:[#allocation2] sm:$0xff]  ;;  %v66_v48 = vld [vmem:[#allocation2 + $0x28] sm:$0xff] }
  0x36   :  { %v63_v47 = vld [vmem:[#allocation2 + $0x10] sm:$0xff]  ;;  %v68_v49 = vld [vmem:[#allocation2 + $0x38] sm:$0xff]  ;;  %v65_v52 = vld [vmem:[#allocation2 + $0x20] sm:$0xff] }
  0x37   :  { %1198 = vmatpush3.bf16.msra.mxu1 %v1408_v31  ;;  %v93_v50 = vpack.c.bf16 %v63_v47, %v61_v46  ;;  %v96_v51 = vpack.c.bf16 %v68_v49, %v66_v48  ;;  %v67_v53 = vld [vmem:[#allocation2 + $0x30] sm:$0xff]  ;;  %v70_v54 = vld [vmem:[#allocation2 + $0x48] sm:$0xff]  ;;  %v72_v55 = vld [vmem:[#allocation2 + $0x58] sm:$0xff] }
  0x38   :  { %322 = vmatpush1.bf16.msra.mxu0 %v1369_v9  ;;  %1199 = vmatprep.subr.bf16.mxu1 %v1409_v32  ;;  %v95_v56 = vpack.c.bf16 %v67_v53, %v65_v52  ;;  %v98_v57 = vpack.c.bf16 %v72_v55, %v70_v54  ;;  %v69_v58 = vld [vmem:[#allocation2 + $0x40] sm:$0xff]  ;;  %v71_v59 = vld [vmem:[#allocation2 + $0x50] sm:$0xff]  ;;  %v74_v60 = vld [vmem:[#allocation2 + $0x68] sm:$0xff] }
  0x39   :  { %323 = vmatprep.subr.bf16.mxu0 %v1370_v10  ;;  %v76_v61 = vld [vmem:[#allocation2 + $0x78] sm:$0xff]  ;;  %v97_v62 = vpack.c.bf16 %v71_v59, %v69_v58  ;;  %v73_v0 = vld [vmem:[#allocation2 + $0x60] sm:$0xff]  ;;  %v75_v1 = vld [vmem:[#allocation2 + $0x70] sm:$0xff] }
  0x3a   :  { %v100_v63 = vpack.c.bf16 %v76_v61, %v74_v60  ;;  %v78_v2 = vld [vmem:[#allocation2 + $0x88] sm:$0xff]  ;;  %v80_v3 = vld [vmem:[#allocation2 + $0x98] sm:$0xff]  ;;  %v99_v4 = vpack.c.bf16 %v75_v1, %v73_v0  ;;  %v77_v6 = vld [vmem:[#allocation2 + $0x80] sm:$0xff] }
  0x3b   :  { %1200 = vmatpush3.bf16.msra.mxu1 %v1410_v35  ;;  %v102_v5 = vpack.c.bf16 %v80_v3, %v78_v2  ;;  %v79_v7 = vld [vmem:[#allocation2 + $0x90] sm:$0xff]  ;;  %v82_v8 = vld [vmem:[#allocation2 + $0xa8] sm:$0xff]  ;;  %v84_v9 = vld [vmem:[#allocation2 + $0xb8] sm:$0xff] }
  0x3c   :  { %324 = vmatpush1.bf16.msra.mxu0 %v1372_v11  ;;  %1201 = vmatprep.subr.bf16.mxu1 %v1411_v36  ;;  %v101_v10 = vpack.c.bf16 %v79_v7, %v77_v6  ;;  %v104_v11 = vpack.c.bf16 %v84_v9, %v82_v8  ;;  %v83_v13 = vld [vmem:[#allocation2 + $0xb0] sm:$0xff]  ;;  %v86_v14 = vld [vmem:[#allocation2 + $0xc8] sm:$0xff]  ;;  %v88_v15 = vld [vmem:[#allocation2 + $0xd8] sm:$0xff] }
  0x3d   :  { %325 = vmatprep.subr.bf16.mxu0 %v1373_v12  ;;  %v81_v12 = vld [vmem:[#allocation2 + $0xa0] sm:$0xff]  ;;  %v1414_v27 = vld [vmem:[%s1834_s3 + $0x28] sm:$0xff]   ;;  %v1415_v28 = vld [vmem:[%s1834_s3 + $0x70] sm:$0xff]  }
  0x3e   :  { %v89_v24 = vld [vmem:[#allocation2 + $0xe0] sm:$0xff]  ;;  %v1418_v31 = vld [vmem:[%s1834_s3 + $0x38] sm:$0xff]   ;;  %v1421_v1 = vld [vmem:[%s1836_s5 + $0x10] sm:$0xff]  }
  0x3f   :  { %1202 = vmatpush3.bf16.msra.mxu1 %v1412_v38  ;;  %v1419_v32 = vld [vmem:[%s1836_s5] sm:$0xff]  }
  0x40   :  { %326 = vmatpush1.bf16.msra.mxu0 %v1375_v16  ;;  %1203 = vmatprep.subr.bf16.mxu1 %v1413_v40  ;;  %v103_v16 = vpack.c.bf16 %v83_v13, %v81_v12  ;;  %v141_v36 = vld [vmem:[%s1833_s2] sm:$0x3] }
  0x41   :  { %327 = vmatprep.subr.bf16.mxu0 %v1376_v17  ;;  %v106_v17 = vpack.c.bf16 %v88_v15, %v86_v14 }
  0x43   :  { %1204 = vmatpush3.bf16.msra.mxu1 %v1414_v27 }
  0x44   :  { %328 = vmatpush1.bf16.msra.mxu0 %v1378_v18  ;;  %v85_v18 = vld [vmem:[#allocation2 + $0xc0] sm:$0xff]  ;;  %1205 = vmatprep.subr.bf16.mxu1 %v1415_v28 }
  0x45   :  { %329 = vmatprep.subr.bf16.mxu0 %v1379_v19  ;;  %v87_v19 = vld [vmem:[#allocation2 + $0xd0] sm:$0xff] }
  0x46   :  { %v105_v22 = vpack.c.bf16 %v87_v19, %v85_v18 }
  0x48   :  { %330 = vmatpush1.bf16.msra.mxu0 %v1381_v20  ;;  %v90_v20 = vld [vmem:[#allocation2 + $0xe8] sm:$0xff] }
  0x49   :  { %331 = vmatprep.subr.bf16.mxu0 %v1382_v21  ;;  %v92_v21 = vld [vmem:[#allocation2 + $0xf8] sm:$0xff] }
  0x4c   :  { %332 = vmatpush1.bf16.msra.mxu0 %v1384_v23  ;;  %v108_v23 = vpack.c.bf16 %v92_v21, %v90_v20 }
  0x4d   :  { %333 = vmatprep.subr.bf16.mxu0 %v1385_v25  ;;  %v91_v25 = vld [vmem:[#allocation2 + $0xf0] sm:$0xff] }
  0x4e   :  { %v107_v26 = vpack.c.bf16 %v91_v25, %v89_v24 }
  0x50   :  { %334 = vmatpush1.bf16.msra.mxu0 %v1387_v29  ;;  %v1416_v29 = vld [vmem:[%s1834_s3 + $0x30] sm:$0xff]  }
  0x51   :  { %335 = vmatprep.subr.bf16.mxu0 %v1388_v30  ;;  %1206 = vmatpush3.bf16.msra.mxu1 %v1416_v29  ;;  %v1417_v30 = vld [vmem:[%s1834_s3 + $0x78] sm:$0xff]  }
  0x52   :  { %1207 = vmatprep.subr.bf16.mxu1 %v1417_v30 }
  0x54   :  { %336 = vmatpush1.bf16.msra.mxu0 %v1390_v33  ;;  %v143_v33 = vlaneseq }
  0x55   :  { %337 = vmatprep.subr.bf16.mxu0 %v1391_v34  ;;  %1208 = vmatpush3.bf16.msra.mxu1 %v1418_v31 }
  0x56   :  { %1285 = vmatprep.subr.bf16.mxu1 %v1419_v32  ;;  %v144_v34 = vshrl.u32 %v143_v33, 7 }
  0x58   :  { %338 = vmatpush1.bf16.msra.mxu0 %v1393_v37  ;;  %v145_v35 = vsub.s32 0, %v144_v34  ;;  %v149_v37 = vsub.s32 1, %v144_v34 }
  0x59   :  { %339 = vmatprep.subr.bf16.mxu0 %v1394_v39 }
  0x5a   :  { %v1645_v38 = vrot.slane %v141_v36, %v145_v35  ;;  %v1647_v39 = vrot.slane %v141_v36, %v149_v37 }
  0x5c   :  { %340 = vmatpush1.bf16.msra.mxu0 %v1396_v41 }
  0x5d   :  { %341 = vmatprep.subr.bf16.mxu0 %v1397_v42 }
  0x60   :  { %342 = vmatpush1.bf16.msra.mxu0 %v1399_v43 }
  0x61   :  { %343 = vmatprep.subr.bf16.mxu0 %v1400_v44 }
  0x64   :  { %344 = vmatpush1.bf16.msra.mxu0 %v1402_v45 }
  0x67   :  { %346 = vmatmul.mubr.bf16.vlgmr.msra.gmra.mrb[0].mxu0 %v93_v50 }
  0x68   :  { %355 = vmatprep.mubr.bf16.mxu0 %v96_v51 }
  0x6f   :  { %356 = vmatmul.mubr.bf16.gmra.mrb[4].mxu0 %v95_v56 }
  0x70   :  { %365 = vmatprep.mubr.bf16.mxu0 %v98_v57  ;;  %v1420_v57 = vld [vmem:[%s1836_s5 + $0x8] sm:$0xff]  }
  0x77   :  { %366 = vmatmul.mubr.bf16.gmra.mrb[8].mxu0 %v97_v62 }
  0x78   :  { %375 = vmatprep.mubr.bf16.mxu0 %v100_v63 }
  0x7f   :  { %376 = vmatmul.mubr.bf16.gmra.mrb[12].mxu0 %v99_v4 }
  0x80   :  { %385 = vmatprep.mubr.bf16.mxu0 %v102_v5 }
  0x87   :  { %386 = vmatmul.mubr.bf16.gmra.mrb[16].mxu0 %v101_v10 }
  0x88   :  { %395 = vmatprep.mubr.bf16.mxu0 %v104_v11 }
  0x8f   :  { %396 = vmatmul.mubr.bf16.gmra.mrb[20].mxu0 %v103_v16 }
  0x90   :  { %405 = vmatprep.mubr.bf16.mxu0 %v106_v17 }
  0x97   :  { %406 = vmatmul.mubr.bf16.gmra.mrb[24].mxu0 %v105_v22 }
  0x98   :  { %415 = vmatprep.mubr.bf16.mxu0 %v108_v23 }
  0x9f   :  { %416 = vmatmul.mubr.bf16.gmra.mrb[28].mxu0 %v107_v26 }
 0x13a   :  { %v347_v40 = vpop.f32.mrb[0].mxu0 }
 0x13b   :  { %v348_v41 = vadd.f32 %v347_v40, %v1645_v38  ;;  %v349_v42 = vpop.f32.mrb[1].mxu0 }
 0x13c   :  { %v350_v43 = vadd.f32 %v349_v42, %v1647_v39  ;;  %v351_v44 = vpop.f32.mrb[2].mxu0 }
 0x13d   :  { %v352_v45 = vadd.f32 %v351_v44, %v1645_v38  ;;  %v353_v46 = vpop.f32.mrb[3].mxu0  ;;  %v426_v48 = vmax.f32 %v348_v41, 0.0 }
 0x13e   :  { %v354_v47 = vadd.f32 %v353_v46, %v1647_v39  ;;  %v427_v50 = vmax.f32 %v350_v43, 0.0 }
 0x13f   :  { %v428_v49 = vmax.f32 %v352_v45, 0.0 }
 0x140   :  { %v429_v51 = vmax.f32 %v354_v47, 0.0 }
 0x141   :  { %v458_v52 = vpack.c.bf16 %v428_v49, %v426_v48 }
 0x142   :  { %v357_v53 = vpop.f32.mrb[4].mxu0  ;;  %v459_v54 = vpack.c.bf16 %v429_v51, %v427_v50 }
 0x143   :  { %v358_v55 = vadd.f32 %v357_v53, %v1645_v38  ;;  %v359_v56 = vpop.f32.mrb[5].mxu0 }
 0x144   :  { %v360_v58 = vadd.f32 %v359_v56, %v1647_v39  ;;  %v361_v59 = vpop.f32.mrb[6].mxu0  ;;  %641 = vmatprep.mubr.bf16.mxu1 %v459_v54 }
 0x145   :  { %v362_v60 = vadd.f32 %v361_v59, %v1645_v38  ;;  %v363_v61 = vpop.f32.mrb[7].mxu0  ;;  %642 = vmatmul.mubr.bf16.vlgmr.msra.gmra.mrb[0].mxu1 %v458_v52  ;;  %v430_v63 = vmax.f32 %v358_v55, 0.0 }
 0x146   :  { %v364_v62 = vadd.f32 %v363_v61, %v1647_v39  ;;  %1286 = vmatpush3.bf16.msra.mxu1 %v1419_v32  ;;  %v431_v2 = vmax.f32 %v360_v58, 0.0 }
 0x147   :  { %v432_v0 = vmax.f32 %v362_v60, 0.0  ;;  %1287 = vmatprep.subr.bf16.mxu1 %v1420_v57 }
 0x148   :  { %v433_v3 = vmax.f32 %v364_v62, 0.0 }
 0x149   :  { %v460_v4 = vpack.c.bf16 %v432_v0, %v430_v63 }
 0x14a   :  { %v461_v5 = vpack.c.bf16 %v433_v3, %v431_v2  ;;  %v367_v6 = vpop.f32.mrb[8].mxu0  ;;  %1288 = vmatpush3.bf16.msra.mxu1 %v1420_v57 }
 0x14b   :  { %v368_v7 = vadd.f32 %v367_v6, %v1645_v38  ;;  %v369_v8 = vpop.f32.mrb[9].mxu0  ;;  %1289 = vmatprep.subr.bf16.mxu1 %v1421_v1 }
 0x14c   :  { %v370_v9 = vadd.f32 %v369_v8, %v1647_v39  ;;  %v371_v10 = vpop.f32.mrb[10].mxu0  ;;  %649 = vmatprep.mubr.bf16.mxu1 %v461_v5 }
 0x14d   :  { %v372_v11 = vadd.f32 %v371_v10, %v1645_v38  ;;  %v373_v12 = vpop.f32.mrb[11].mxu0  ;;  %650 = vmatmul.mubr.bf16.gmra.mrb[4].mxu1 %v460_v4  ;;  %v434_v14 = vmax.f32 %v368_v7, 0.0 }
 0x14e   :  { %v374_v13 = vadd.f32 %v373_v12, %v1647_v39  ;;  %1290 = vmatpush3.bf16.msra.mxu1 %v1421_v1  ;;  %v435_v16 = vmax.f32 %v370_v9, 0.0 }
 0x14f   :  { %v436_v15 = vmax.f32 %v372_v11, 0.0 }
 0x150   :  { %v437_v17 = vmax.f32 %v374_v13, 0.0 }
 0x151   :  { %v462_v18 = vpack.c.bf16 %v436_v15, %v434_v14 }
 0x152   :  { %v463_v19 = vpack.c.bf16 %v437_v17, %v435_v16  ;;  %v377_v20 = vpop.f32.mrb[12].mxu0 }
 0x153   :  { %v378_v21 = vadd.f32 %v377_v20, %v1645_v38  ;;  %v379_v22 = vpop.f32.mrb[13].mxu0 }
 0x154   :  { %v380_v23 = vadd.f32 %v379_v22, %v1647_v39  ;;  %v381_v24 = vpop.f32.mrb[14].mxu0  ;;  %657 = vmatprep.mubr.bf16.mxu1 %v463_v19 }
 0x155   :  { %v382_v25 = vadd.f32 %v381_v24, %v1645_v38  ;;  %v383_v26 = vpop.f32.mrb[15].mxu0  ;;  %658 = vmatmul.mubr.bf16.gmra.mrb[8].mxu1 %v462_v18  ;;  %v438_v28 = vmax.f32 %v378_v21, 0.0 }
 0x156   :  { %v384_v27 = vadd.f32 %v383_v26, %v1647_v39  ;;  %v439_v30 = vmax.f32 %v380_v23, 0.0 }
 0x157   :  { %v440_v29 = vmax.f32 %v382_v25, 0.0 }
 0x158   :  { %v441_v31 = vmax.f32 %v384_v27, 0.0 }
 0x159   :  { %v464_v32 = vpack.c.bf16 %v440_v29, %v438_v28  ;;  %v1422_v28 = vld [vmem:[%s1836_s5 + $0x18] sm:$0xff]   ;;  %v1425_v29 = vld [vmem:[%s1836_s5 + $0x30] sm:$0xff]  }
 0x15a   :  { %v465_v33 = vpack.c.bf16 %v441_v31, %v439_v30  ;;  %v387_v34 = vpop.f32.mrb[16].mxu0  ;;  %1291 = vmatprep.subr.bf16.mxu1 %v1422_v28  ;;  %v1426_v30 = vld [vmem:[%s1836_s5 + $0x38] sm:$0xff]   ;;  %v1427_v31 = vld [vmem:[%s1838_s7] sm:$0xff]  }
 0x15b   :  { %v388_v35 = vadd.f32 %v387_v34, %v1645_v38  ;;  %v389_v36 = vpop.f32.mrb[17].mxu0  ;;  %1292 = vmatpush3.bf16.msra.mxu1 %v1422_v28  ;;  %1317 = vmatprep.subr.bf16.mxu0 %v1427_v31  ;;  %v1711_v34 = vld [vmem:[%s1835_s4] ss:$0 sm:$0xff] }
 0x15c   :  { %v390_v37 = vadd.f32 %v389_v36, %v1647_v39  ;;  %v391_v40 = vpop.f32.mrb[18].mxu0  ;;  %665 = vmatprep.mubr.bf16.mxu1 %v465_v33  ;;  %1318 = vmatpush3.bf16.msra.mxu0 %v1427_v31 }
 0x15d   :  { %v392_v41 = vadd.f32 %v391_v40, %v1645_v38  ;;  %v393_v42 = vpop.f32.mrb[19].mxu0  ;;  %666 = vmatmul.mubr.bf16.gmra.mrb[12].mxu1 %v464_v32  ;;  %v442_v44 = vmax.f32 %v388_v35, 0.0  ;;  %v1428_v32 = vld [vmem:[%s1838_s7 + $0x8] sm:$0xff]  }
 0x15e   :  { %v394_v43 = vadd.f32 %v393_v42, %v1647_v39  ;;  %v443_v46 = vmax.f32 %v390_v37, 0.0  ;;  %1319 = vmatprep.subr.bf16.mxu0 %v1428_v32 }
 0x15f   :  { %v444_v45 = vmax.f32 %v392_v41, 0.0 }
 0x160   :  { %v445_v47 = vmax.f32 %v394_v43, 0.0  ;;  %1320 = vmatpush3.bf16.msra.mxu0 %v1428_v32 }
 0x161   :  { %v466_v48 = vpack.c.bf16 %v444_v45, %v442_v44 }
 0x162   :  { %v467_v49 = vpack.c.bf16 %v445_v47, %v443_v46  ;;  %v397_v50 = vpop.f32.mrb[20].mxu0 }
 0x163   :  { %v398_v51 = vadd.f32 %v397_v50, %v1645_v38  ;;  %v399_v52 = vpop.f32.mrb[21].mxu0 }
 0x164   :  { %v400_v53 = vadd.f32 %v399_v52, %v1647_v39  ;;  %v401_v54 = vpop.f32.mrb[22].mxu0  ;;  %673 = vmatprep.mubr.bf16.mxu1 %v467_v49 }
 0x165   :  { %v402_v55 = vadd.f32 %v401_v54, %v1645_v38  ;;  %v403_v56 = vpop.f32.mrb[23].mxu0  ;;  %674 = vmatmul.mubr.bf16.gmra.mrb[16].mxu1 %v466_v48  ;;  %v446_v58 = vmax.f32 %v398_v51, 0.0 }
 0x166   :  { %v404_v57 = vadd.f32 %v403_v56, %v1647_v39  ;;  %v447_v60 = vmax.f32 %v400_v53, 0.0 }
 0x167   :  { %v448_v59 = vmax.f32 %v402_v55, 0.0 }
 0x168   :  { %v449_v61 = vmax.f32 %v404_v57, 0.0 }
 0x169   :  { %v468_v62 = vpack.c.bf16 %v448_v59, %v446_v58 }
 0x16a   :  { %v469_v63 = vpack.c.bf16 %v449_v61, %v447_v60  ;;  %v407_v0 = vpop.f32.mrb[24].mxu0 }
 0x16b   :  { %v408_v1 = vadd.f32 %v407_v0, %v1645_v38  ;;  %v409_v2 = vpop.f32.mrb[25].mxu0 }
 0x16c   :  { %v410_v3 = vadd.f32 %v409_v2, %v1647_v39  ;;  %v411_v4 = vpop.f32.mrb[26].mxu0  ;;  %681 = vmatprep.mubr.bf16.mxu1 %v469_v63 }
 0x16d   :  { %v412_v5 = vadd.f32 %v411_v4, %v1645_v38  ;;  %v413_v6 = vpop.f32.mrb[27].mxu0  ;;  %682 = vmatmul.mubr.bf16.gmra.mrb[20].mxu1 %v468_v62  ;;  %v450_v8 = vmax.f32 %v408_v1, 0.0 }
 0x16e   :  { %v414_v7 = vadd.f32 %v413_v6, %v1647_v39  ;;  %v451_v10 = vmax.f32 %v410_v3, 0.0 }
 0x16f   :  { %v452_v9 = vmax.f32 %v412_v5, 0.0 }
 0x170   :  { %v453_v11 = vmax.f32 %v414_v7, 0.0 }
 0x171   :  { %v470_v12 = vpack.c.bf16 %v452_v9, %v450_v8 }
 0x172   :  { %v471_v13 = vpack.c.bf16 %v453_v11, %v451_v10  ;;  %v417_v14 = vpop.f32.mrb[28].mxu0 }
 0x173   :  { %v418_v15 = vadd.f32 %v417_v14, %v1645_v38  ;;  %v419_v16 = vpop.f32.mrb[29].mxu0 }
 0x174   :  { %v420_v17 = vadd.f32 %v419_v16, %v1647_v39  ;;  %v421_v18 = vpop.f32.mrb[30].mxu0  ;;  %689 = vmatprep.mubr.bf16.mxu1 %v471_v13 }
 0x175   :  { %v422_v19 = vadd.f32 %v421_v18, %v1645_v38  ;;  %v423_v20 = vpop.f32.mrb[31].mxu0  ;;  %690 = vmatmul.mubr.bf16.gmra.mrb[24].mxu1 %v470_v12  ;;  %v454_v22 = vmax.f32 %v418_v15, 0.0  ;;  %v1423_v38 = vld [vmem:[%s1836_s5 + $0x20] sm:$0xff]  }
 0x176   :  { %v424_v21 = vadd.f32 %v423_v20, %v1647_v39  ;;  %v455_v24 = vmax.f32 %v420_v17, 0.0  ;;  %1293 = vmatprep.subr.bf16.mxu1 %v1423_v38  ;;  %v1424_v39 = vld [vmem:[%s1836_s5 + $0x28] sm:$0xff]  }
 0x177   :  { %v456_v23 = vmax.f32 %v422_v19, 0.0  ;;  %1294 = vmatpush3.bf16.msra.mxu1 %v1423_v38 }
 0x178   :  { %v457_v25 = vmax.f32 %v424_v21, 0.0  ;;  %1295 = vmatprep.subr.bf16.mxu1 %v1424_v39 }
 0x179   :  { %v472_v26 = vpack.c.bf16 %v456_v23, %v454_v22 }
 0x17a   :  { %v473_v27 = vpack.c.bf16 %v457_v25, %v455_v24 }
 0x17b   :  { %1296 = vmatpush3.bf16.msra.mxu1 %v1424_v39 }
 0x17c   :  { %697 = vmatprep.mubr.bf16.mxu1 %v473_v27  ;;  %1297 = vmatprep.subr.bf16.mxu1 %v1425_v29 }
 0x17d   :  { %698 = vmatmul.mubr.bf16.gmra.mrb[28].mxu1 %v472_v26 }
 0x17f   :  { %1298 = vmatpush3.bf16.msra.mxu1 %v1425_v29 }
 0x180   :  { %1299 = vmatprep.subr.bf16.mxu1 %v1426_v30 }
 0x183   :  { %1300 = vmatpush3.bf16.msra.mxu1 %v1426_v30 }
 0x184   :  { %1341 = vmatprep.subr.bf16.mxu1 %v1427_v31 }
 0x218   :  { %v1209_v33 = vpop.f32.mrb[0].mxu1 }
 0x219   :  { %v1210_v35 = vpop.f32.mrb[1].mxu1 }
 0x21a   :  { %v1211_v36 = vadd.f32 %v1210_v35, %v1209_v33  ;;  %v1212_v37 = vpop.f32.mrb[2].mxu1 }
 0x21b   :  { %v1213_v40 = vpop.f32.mrb[3].mxu1 }
 0x21c   :  { %v644_v41 = vadd.f32 %v1211_v36, %v1711_v34  ;;  %v1214_v42 = vadd.f32 %v1213_v40, %v1212_v37 }
 0x21e   :  { %v647_v43 = vadd.f32 %v1214_v42, %v1711_v34  ;;  %v706_v44 = vmax.f32 %v644_v41, 0.0 }
 0x220   :  { %v707_v45 = vmax.f32 %v647_v43, 0.0  ;;  %v1215_v46 = vpop.f32.mrb[4].mxu1 }
 0x221   :  { %v1216_v47 = vpop.f32.mrb[5].mxu1 }
 0x222   :  { %v1217_v48 = vadd.f32 %v1216_v47, %v1215_v46  ;;  %v1218_v49 = vpop.f32.mrb[6].mxu1  ;;  %v722_v50 = vpack.c.bf16 %v707_v45, %v706_v44 }
 0x223   :  { %v1219_v51 = vpop.f32.mrb[7].mxu1 }
 0x224   :  { %v652_v52 = vadd.f32 %v1217_v48, %v1711_v34  ;;  %v1220_v53 = vadd.f32 %v1219_v51, %v1218_v49  ;;  %1301 = vmatprep.mubr.bf16.mxu1 %v722_v50 }
 0x226   :  { %v655_v54 = vadd.f32 %v1220_v53, %v1711_v34  ;;  %v708_v55 = vmax.f32 %v652_v52, 0.0 }
 0x228   :  { %v709_v56 = vmax.f32 %v655_v54, 0.0  ;;  %v1221_v57 = vpop.f32.mrb[8].mxu1 }
 0x229   :  { %v1222_v58 = vpop.f32.mrb[9].mxu1 }
 0x22a   :  { %v723_v59 = vpack.c.bf16 %v709_v56, %v708_v55  ;;  %v1223_v60 = vadd.f32 %v1222_v58, %v1221_v57  ;;  %v1224_v61 = vpop.f32.mrb[10].mxu1 }
 0x22b   :  { %v1225_v62 = vpop.f32.mrb[11].mxu1 }
 0x22c   :  { %v660_v63 = vadd.f32 %v1223_v60, %v1711_v34  ;;  %v1226_v0 = vadd.f32 %v1225_v62, %v1224_v61  ;;  %1302 = vmatmul.mubr.bf16.vlgmr.msra.gmra.mrb[32].mxu1 %v723_v59  ;;  %v1429_v61 = vld [vmem:[%s1838_s7 + $0x10] sm:$0xff]   ;;  %v1430_v62 = vld [vmem:[%s1838_s7 + $0x18] sm:$0xff]  }
 0x22d   :  { %1345 = vmatpush3.bf16.msra.mxu1 %v1427_v31  ;;  %1321 = vmatprep.subr.bf16.mxu0 %v1429_v61 }
 0x22e   :  { %v663_v1 = vadd.f32 %v1226_v0, %v1711_v34  ;;  %1342 = vmatprep.subr.bf16.mxu1 %v1428_v32  ;;  %v710_v2 = vmax.f32 %v660_v63, 0.0  ;;  %1322 = vmatpush3.bf16.msra.mxu0 %v1429_v61 }
 0x22f   :  { %1323 = vmatprep.subr.bf16.mxu0 %v1430_v62 }
 0x230   :  { %v711_v3 = vmax.f32 %v663_v1, 0.0  ;;  %v1227_v4 = vpop.f32.mrb[12].mxu1 }
 0x231   :  { %v1228_v5 = vpop.f32.mrb[13].mxu1  ;;  %1346 = vmatpush3.bf16.msra.mxu1 %v1428_v32 }
 0x232   :  { %v1229_v6 = vadd.f32 %v1228_v5, %v1227_v4  ;;  %v1230_v7 = vpop.f32.mrb[14].mxu1  ;;  %v724_v8 = vpack.c.bf16 %v711_v3, %v710_v2  ;;  %1343 = vmatprep.subr.bf16.mxu1 %v1429_v61  ;;  %1324 = vmatpush3.bf16.msra.mxu0 %v1430_v62 }
 0x233   :  { %v1231_v9 = vpop.f32.mrb[15].mxu1 }
 0x234   :  { %v668_v10 = vadd.f32 %v1229_v6, %v1711_v34  ;;  %v1232_v11 = vadd.f32 %v1231_v9, %v1230_v7  ;;  %1305 = vmatprep.mubr.bf16.mxu1 %v724_v8 }
 0x235   :  { %1347 = vmatpush3.bf16.msra.mxu1 %v1429_v61 }
 0x236   :  { %v671_v12 = vadd.f32 %v1232_v11, %v1711_v34  ;;  %v712_v13 = vmax.f32 %v668_v10, 0.0  ;;  %1344 = vmatprep.subr.bf16.mxu1 %v1430_v62 }
 0x238   :  { %v713_v14 = vmax.f32 %v671_v12, 0.0  ;;  %v1233_v15 = vpop.f32.mrb[16].mxu1 }
 0x239   :  { %v1234_v16 = vpop.f32.mrb[17].mxu1  ;;  %1348 = vmatpush3.bf16.msra.mxu1 %v1430_v62 }
 0x23a   :  { %v1235_v17 = vadd.f32 %v1234_v16, %v1233_v15  ;;  %v1236_v18 = vpop.f32.mrb[18].mxu1  ;;  %v725_v19 = vpack.c.bf16 %v713_v14, %v712_v13 }
 0x23b   :  { %v1237_v20 = vpop.f32.mrb[19].mxu1 }
 0x23c   :  { %v676_v21 = vadd.f32 %v1235_v17, %v1711_v34  ;;  %v1238_v22 = vadd.f32 %v1237_v20, %v1236_v18  ;;  %1306 = vmatmul.mubr.bf16.gmra.mrb[36].mxu1 %v725_v19 }
 0x23e   :  { %v679_v23 = vadd.f32 %v1238_v22, %v1711_v34  ;;  %v714_v24 = vmax.f32 %v676_v21, 0.0 }
 0x240   :  { %v715_v25 = vmax.f32 %v679_v23, 0.0  ;;  %v1239_v26 = vpop.f32.mrb[20].mxu1 }
 0x241   :  { %v1240_v27 = vpop.f32.mrb[21].mxu1 }
 0x242   :  { %v1241_v28 = vadd.f32 %v1240_v27, %v1239_v26  ;;  %v1242_v38 = vpop.f32.mrb[22].mxu1  ;;  %v726_v39 = vpack.c.bf16 %v715_v25, %v714_v24 }
 0x243   :  { %v1243_v29 = vpop.f32.mrb[23].mxu1 }
 0x244   :  { %v684_v30 = vadd.f32 %v1241_v28, %v1711_v34  ;;  %v1244_v31 = vadd.f32 %v1243_v29, %v1242_v38  ;;  %1309 = vmatprep.mubr.bf16.mxu1 %v726_v39 }
 0x246   :  { %v687_v32 = vadd.f32 %v1244_v31, %v1711_v34  ;;  %v716_v33 = vmax.f32 %v684_v30, 0.0 }
 0x248   :  { %v717_v35 = vmax.f32 %v687_v32, 0.0  ;;  %v1245_v36 = vpop.f32.mrb[24].mxu1 }
 0x249   :  { %v1246_v37 = vpop.f32.mrb[25].mxu1 }
 0x24a   :  { %v1247_v40 = vadd.f32 %v1246_v37, %v1245_v36  ;;  %v1248_v41 = vpop.f32.mrb[26].mxu1  ;;  %v727_v42 = vpack.c.bf16 %v717_v35, %v716_v33 }
 0x24b   :  { %v1249_v43 = vpop.f32.mrb[27].mxu1 }
 0x24c   :  { %v692_v44 = vadd.f32 %v1247_v40, %v1711_v34  ;;  %v1250_v45 = vadd.f32 %v1249_v43, %v1248_v41  ;;  %1310 = vmatmul.mubr.bf16.gmra.mrb[40].mxu1 %v727_v42 }
 0x24e   :  { %v695_v46 = vadd.f32 %v1250_v45, %v1711_v34  ;;  %v718_v47 = vmax.f32 %v692_v44, 0.0 }
 0x250   :  { %v719_v48 = vmax.f32 %v695_v46, 0.0  ;;  %v1251_v49 = vpop.f32.mrb[28].mxu1 }
 0x251   :  { %v1252_v50 = vpop.f32.mrb[29].mxu1 }
 0x252   :  { %v1253_v51 = vadd.f32 %v1252_v50, %v1251_v49  ;;  %v1254_v52 = vpop.f32.mrb[30].mxu1  ;;  %v728_v53 = vpack.c.bf16 %v719_v48, %v718_v47 }
 0x253   :  { %v1255_v54 = vpop.f32.mrb[31].mxu1 }
 0x254   :  { %v700_v55 = vadd.f32 %v1253_v51, %v1711_v34  ;;  %v1256_v56 = vadd.f32 %v1255_v54, %v1254_v52  ;;  %1313 = vmatprep.mubr.bf16.mxu1 %v728_v53 }
 0x256   :  { %v703_v57 = vadd.f32 %v1256_v56, %v1711_v34  ;;  %v720_v58 = vmax.f32 %v700_v55, 0.0  ;;  %v1171_v34 = vld [vmem:[%s1837_s6] ss:$0 sm:$0xff] }
 0x257   :  { %v1749_v56 = vld [vmem:[%s1839_s8] ss:$0 sm:$0xff] }
 0x258   :  { %v721_v59 = vmax.f32 %v703_v57, 0.0 }
 0x25a   :  { %v729_v60 = vpack.c.bf16 %v721_v59, %v720_v58 }
 0x25c   :  { %1314 = vmatmul.mubr.bf16.gmra.mrb[44].mxu1 %v729_v60 }
 0x2ff   :  { %v1303_v63 = vpop.f32.mrb[32].mxu1 }
 0x300   :  { %v844_v0 = vadd.f32 %v1303_v63, %v1171_v34  ;;  %v835_v1 = vpop.f32.mrb[33].mxu1 }
 0x301   :  { %v836_v2 = vadd.f32 %v1171_v34, %v835_v1  ;;  %v1304_v3 = vpop.f32.mrb[34].mxu1 }
 0x302   :  { %v847_v4 = vadd.f32 %v1304_v3, %v1171_v34  ;;  %v838_v5 = vpop.f32.mrb[35].mxu1  ;;  %v900_v7 = vmax.f32 %v844_v0, 0.0 }
 0x303   :  { %v839_v6 = vadd.f32 %v1171_v34, %v838_v5  ;;  %v898_v9 = vmax.f32 %v836_v2, 0.0 }
 0x304   :  { %v901_v8 = vmax.f32 %v847_v4, 0.0 }
 0x305   :  { %v899_v10 = vmax.f32 %v839_v6, 0.0 }
 0x306   :  { %v915_v11 = vpack.c.bf16 %v901_v8, %v900_v7 }
 0x307   :  { %v914_v12 = vpack.c.bf16 %v899_v10, %v898_v9 }
 0x309   :  { %1325 = vmatprep.mubr.msk.bf16.mxu0 %vm961_vm0, %v914_v12 }
 0x30a   :  { %1326 = vmatmul.mubr.msk.bf16.vlgmr.msra.gmra.mrb[32].mxu0 %vm961_vm0, %v915_v11 }
 0x30f   :  { %v1307_v13 = vpop.f32.mrb[36].mxu1 }
 0x310   :  { %v860_v14 = vadd.f32 %v1307_v13, %v1171_v34  ;;  %v851_v15 = vpop.f32.mrb[37].mxu1 }
 0x311   :  { %v852_v16 = vadd.f32 %v1171_v34, %v851_v15  ;;  %v1308_v17 = vpop.f32.mrb[38].mxu1 }
 0x312   :  { %v863_v18 = vadd.f32 %v1308_v17, %v1171_v34  ;;  %v854_v19 = vpop.f32.mrb[39].mxu1  ;;  %v904_v21 = vmax.f32 %v860_v14, 0.0 }
 0x313   :  { %v855_v20 = vadd.f32 %v1171_v34, %v854_v19  ;;  %v902_v23 = vmax.f32 %v852_v16, 0.0 }
 0x314   :  { %v905_v22 = vmax.f32 %v863_v18, 0.0 }
 0x315   :  { %v903_v24 = vmax.f32 %v855_v20, 0.0 }
 0x316   :  { %v917_v25 = vpack.c.bf16 %v905_v22, %v904_v21 }
 0x317   :  { %v916_v26 = vpack.c.bf16 %v903_v24, %v902_v23 }
 0x319   :  { %1329 = vmatprep.mubr.msk.bf16.mxu0 %vm961_vm0, %v916_v26 }
 0x31a   :  { %1330 = vmatmul.mubr.msk.bf16.gmra.mrb[36].mxu0 %vm961_vm0, %v917_v25 }
 0x31f   :  { %v1311_v27 = vpop.f32.mrb[40].mxu1 }
 0x320   :  { %v876_v28 = vadd.f32 %v1311_v27, %v1171_v34  ;;  %v867_v38 = vpop.f32.mrb[41].mxu1 }
 0x321   :  { %v868_v39 = vadd.f32 %v1171_v34, %v867_v38  ;;  %v1312_v29 = vpop.f32.mrb[42].mxu1 }
 0x322   :  { %v879_v30 = vadd.f32 %v1312_v29, %v1171_v34  ;;  %v870_v31 = vpop.f32.mrb[43].mxu1  ;;  %v908_v33 = vmax.f32 %v876_v28, 0.0 }
 0x323   :  { %v871_v32 = vadd.f32 %v1171_v34, %v870_v31  ;;  %v906_v36 = vmax.f32 %v868_v39, 0.0 }
 0x324   :  { %v909_v35 = vmax.f32 %v879_v30, 0.0 }
 0x325   :  { %v907_v37 = vmax.f32 %v871_v32, 0.0 }
 0x326   :  { %v919_v40 = vpack.c.bf16 %v909_v35, %v908_v33 }
 0x327   :  { %v918_v41 = vpack.c.bf16 %v907_v37, %v906_v36 }
 0x329   :  { %1333 = vmatprep.mubr.msk.bf16.mxu1 %vm961_vm0, %v918_v41 }
 0x32a   :  { %1334 = vmatmul.mubr.msk.bf16.vlgmr.msra.gmra.mrb[48].mxu1 %vm961_vm0, %v919_v40 }
 0x32f   :  { %v1315_v42 = vpop.f32.mrb[44].mxu1 }
 0x330   :  { %v892_v43 = vadd.f32 %v1315_v42, %v1171_v34  ;;  %v883_v44 = vpop.f32.mrb[45].mxu1 }
 0x331   :  { %v884_v45 = vadd.f32 %v1171_v34, %v883_v44  ;;  %v1316_v46 = vpop.f32.mrb[46].mxu1 }
 0x332   :  { %v895_v47 = vadd.f32 %v1316_v46, %v1171_v34  ;;  %v886_v48 = vpop.f32.mrb[47].mxu1  ;;  %v912_v50 = vmax.f32 %v892_v43, 0.0 }
 0x333   :  { %v887_v49 = vadd.f32 %v1171_v34, %v886_v48  ;;  %v910_v52 = vmax.f32 %v884_v45, 0.0 }
 0x334   :  { %v913_v51 = vmax.f32 %v895_v47, 0.0 }
 0x335   :  { %v911_v53 = vmax.f32 %v887_v49, 0.0 }
 0x336   :  { %v921_v54 = vpack.c.bf16 %v913_v51, %v912_v50 }
 0x337   :  { %v920_v55 = vpack.c.bf16 %v911_v53, %v910_v52 }
 0x339   :  { %1337 = vmatprep.mubr.msk.bf16.mxu1 %vm961_vm0, %v920_v55 }
 0x33a   :  { %1338 = vmatmul.mubr.msk.bf16.gmra.mrb[52].mxu1 %vm961_vm0, %v921_v54 }
 0x3dd   :  { %v1327_v57 = vpop.f32.mrb[32].mxu0 }
 0x3de   :  { %v1029_v58 = vadd.f32 %v1327_v57, %v1749_v56  ;;  %v1020_v59 = vpop.f32.mrb[33].mxu0 }
 0x3df   :  { %v1021_v60 = vadd.f32 %v1749_v56, %v1020_v59  ;;  %v1328_v61 = vpop.f32.mrb[34].mxu0 }
 0x3e0   :  { %1431 = vtanh.f32 %v1029_v58  ;;  %v1032_v62 = vadd.f32 %v1328_v61, %v1749_v56  ;;  %v1023_v34 = vpop.f32.mrb[35].mxu0 }
 0x3e1   :  { %1433 = vtanh.f32 %v1021_v60  ;;  %v1024_v63 = vadd.f32 %v1749_v56, %v1023_v34 }
 0x3e2   :  { %1435 = vtanh.f32 %v1032_v62 }
 0x3e3   :  { %1437 = vtanh.f32 %v1024_v63 }
 0x3ea   :  { %v1432_v0 = vpop.eup %1431 }
 0x3eb   :  { %v1434_v1 = vpop.eup %1433  ;;  %1102 = vst.msk [vmem:[%s1840_s9 + $0x10] sm:$0xff] %vm1099_vm1, %v1432_v0 }
 0x3ec   :  { %v1436_v2 = vpop.eup %1435  ;;  %1100 = vst.msk [vmem:[%s1840_s9] sm:$0xff] %vm1099_vm1, %v1434_v1 }
 0x3ed   :  { %v1438_v3 = vpop.eup %1437  ;;  %1103 = vst.msk [vmem:[%s1840_s9 + $0x18] sm:$0xff] %vm1099_vm1, %v1436_v2  ;;  %v1331_v4 = vpop.f32.mrb[36].mxu0 }
 0x3ee   :  { %1101 = vst.msk [vmem:[%s1840_s9 + $0x8] sm:$0xff] %vm1099_vm1, %v1438_v3  ;;  %v1045_v5 = vadd.f32 %v1331_v4, %v1749_v56  ;;  %v1036_v6 = vpop.f32.mrb[37].mxu0 }
 0x3ef   :  { %v1037_v7 = vadd.f32 %v1749_v56, %v1036_v6  ;;  %v1332_v8 = vpop.f32.mrb[38].mxu0 }
 0x3f0   :  { %1439 = vtanh.f32 %v1045_v5  ;;  %v1048_v9 = vadd.f32 %v1332_v8, %v1749_v56  ;;  %v1039_v10 = vpop.f32.mrb[39].mxu0 }
 0x3f1   :  { %1441 = vtanh.f32 %v1037_v7  ;;  %v1040_v11 = vadd.f32 %v1749_v56, %v1039_v10 }
 0x3f2   :  { %1443 = vtanh.f32 %v1048_v9 }
 0x3f3   :  { %1445 = vtanh.f32 %v1040_v11 }
 0x3fa   :  { %v1440_v12 = vpop.eup %1439 }
 0x3fb   :  { %v1442_v13 = vpop.eup %1441  ;;  %1106 = vst.msk [vmem:[%s1840_s9 + $0x30] sm:$0xff] %vm1099_vm1, %v1440_v12 }
 0x3fc   :  { %v1444_v14 = vpop.eup %1443  ;;  %1104 = vst.msk [vmem:[%s1840_s9 + $0x20] sm:$0xff] %vm1099_vm1, %v1442_v13 }
 0x3fd   :  { %v1446_v15 = vpop.eup %1445  ;;  %1107 = vst.msk [vmem:[%s1840_s9 + $0x38] sm:$0xff] %vm1099_vm1, %v1444_v14  ;;  %v1335_v16 = vpop.f32.mrb[48].mxu1 }
 0x3fe   :  { %1105 = vst.msk [vmem:[%s1840_s9 + $0x28] sm:$0xff] %vm1099_vm1, %v1446_v15  ;;  %v1061_v17 = vadd.f32 %v1335_v16, %v1749_v56  ;;  %v1052_v18 = vpop.f32.mrb[49].mxu1 }
 0x3ff   :  { %v1053_v19 = vadd.f32 %v1749_v56, %v1052_v18  ;;  %v1336_v20 = vpop.f32.mrb[50].mxu1 }
 0x400   :  { %1447 = vtanh.f32 %v1061_v17  ;;  %v1064_v21 = vadd.f32 %v1336_v20, %v1749_v56  ;;  %v1055_v22 = vpop.f32.mrb[51].mxu1 }
 0x401   :  { %1449 = vtanh.f32 %v1053_v19  ;;  %v1056_v23 = vadd.f32 %v1749_v56, %v1055_v22 }
 0x402   :  { %1451 = vtanh.f32 %v1064_v21 }
 0x403   :  { %1453 = vtanh.f32 %v1056_v23 }
 0x40a   :  { %v1448_v24 = vpop.eup %1447 }
 0x40b   :  { %v1450_v25 = vpop.eup %1449  ;;  %1110 = vst.msk [vmem:[%s1840_s9 + $0x50] sm:$0xff] %vm1099_vm1, %v1448_v24 }
 0x40c   :  { %v1452_v26 = vpop.eup %1451  ;;  %1108 = vst.msk [vmem:[%s1840_s9 + $0x40] sm:$0xff] %vm1099_vm1, %v1450_v25 }
 0x40d   :  { %v1454_v27 = vpop.eup %1453  ;;  %1111 = vst.msk [vmem:[%s1840_s9 + $0x58] sm:$0xff] %vm1099_vm1, %v1452_v26  ;;  %v1339_v28 = vpop.f32.mrb[52].mxu1 }
 0x40e   :  { %1109 = vst.msk [vmem:[%s1840_s9 + $0x48] sm:$0xff] %vm1099_vm1, %v1454_v27  ;;  %v1077_v38 = vadd.f32 %v1339_v28, %v1749_v56  ;;  %v1068_v39 = vpop.f32.mrb[53].mxu1 }
 0x40f   :  { %v1069_v29 = vadd.f32 %v1749_v56, %v1068_v39  ;;  %v1340_v30 = vpop.f32.mrb[54].mxu1 }
 0x410   :  { %1455 = vtanh.f32 %v1077_v38  ;;  %v1080_v31 = vadd.f32 %v1340_v30, %v1749_v56  ;;  %v1071_v32 = vpop.f32.mrb[55].mxu1 }
 0x411   :  { %1457 = vtanh.f32 %v1069_v29  ;;  %v1072_v33 = vadd.f32 %v1749_v56, %v1071_v32 }
 0x412   :  { %1459 = vtanh.f32 %v1080_v31 }
 0x413   :  { %1461 = vtanh.f32 %v1072_v33 }
 0x41a   :  { %v1456_v35 = vpop.eup %1455 }
 0x41b   :  { %v1458_v36 = vpop.eup %1457  ;;  %1114 = vst.msk [vmem:[%s1840_s9 + $0x70] sm:$0xff] %vm1099_vm1, %v1456_v35 }
 0x41c   :  { %v1460_v37 = vpop.eup %1459  ;;  %1112 = vst.msk [vmem:[%s1840_s9 + $0x60] sm:$0xff] %vm1099_vm1, %v1458_v36 }
 0x41d   :  { %v1462_v40 = vpop.eup %1461  ;;  %1115 = vst.msk [vmem:[%s1840_s9 + $0x78] sm:$0xff] %vm1099_vm1, %v1460_v37 }
 0x41e   :  { %1113 = vst.msk [vmem:[%s1840_s9 + $0x68] sm:$0xff] %vm1099_vm1, %v1462_v40 }
 0x41f   :  { %1120 = vsyncpa [#allocation3], 1 }
 0x420   :  { %1121 = vsyncpa [#allocation5], 1 }

</bundles_post_ra>
